<compile_context>
chip_gen: v7x
topology: tpu7x:2x2x1
jax: 0.10.0
libtpu: 0.0.40
codegen_flags: <defaults>
</compile_context>

<pallas_src>
import functools
import math

import jax
import jax.numpy as jnp
from jax.experimental import pallas as pl
from jax.experimental.pallas import tpu as pltpu


def get_tau(epoch, t_max=5.0, t_min=0.5, total_epochs=1000):
    return t_max * (t_min / t_max) ** (min(epoch, total_epochs) / total_epochs)


def _hash_uniform(idx, seed):
    """Counter-based RNG: splitmix32-style hash of an int32 element index -> U[0,1)."""
    seed_mix = (int(seed) * 0x9E3779B1 + 0x85EBCA6B) & 0xFFFFFFFF
    h = idx.astype(jnp.uint32) ^ jnp.uint32(seed_mix)
    h = (h ^ (h >> 16)) * jnp.uint32(0x7FEB352D)
    h = (h ^ (h >> 15)) * jnp.uint32(0x846CA68B)
    h = h ^ (h >> 16)
    # top 24 bits -> [0, 1); route through int32 (exact in f32, safe convert).
    mant = (h >> 8).astype(jnp.int32)
    return mant.astype(jnp.float32) * jnp.float32(1.0 / (1 << 24))


def _gumbel_softmax_kernel(x_ref, gs_ref, *, seed, inv_tau, eps, group_w):
    T, L = x_ref.shape                      # static block shape
    i = pl.program_id(0)

    x = x_ref[...].astype(jnp.float32)

    # ---- gumbel noise from a hash of the global flat element index ---------
    row = jax.lax.broadcasted_iota(jnp.int32, (T, L), 0) + i * T
    col = jax.lax.broadcasted_iota(jnp.int32, (T, L), 1)
    u = _hash_uniform(row * L + col, seed)
    gumbel = -jnp.log(-jnp.log(u + eps) + eps)        # 2 EUP logs, lane-dense

    z = (x + gumbel) * inv_tau                        # 1/tau hoisted to wrapper

    # ---- segmented softmax over groups of `group_w` lanes -------------------
    G = L // group_w
    if G <= 1:
        m = jnp.max(z, axis=-1, keepdims=True)
        e = jnp.exp(z - m)
        s = jnp.sum(e, axis=-1, keepdims=True)
    else:
        W = group_w
        # per-group max, broadcast back so subtract/exp stay lane-dense
        m = jnp.concatenate(
            [jnp.broadcast_to(
                jnp.max(z[:, k * W:(k + 1) * W], axis=-1, keepdims=True), (T, W))
             for k in range(G)], axis=-1)
        e = jnp.exp(z - m)                            # dense EUP exp
        s = jnp.concatenate(
            [jnp.broadcast_to(
                jnp.sum(e[:, k * W:(k + 1) * W], axis=-1, keepdims=True), (T, W))
             for k in range(G)], axis=-1)
    gs_ref[...] = (e / s).astype(gs_ref.dtype)        # exact divide (torch parity)


def gumbel_softmax_forward(x, epoch, seed=0, eps=1e-20):
    """Pallas GumbelSoftmax.forward.

    Returns (x, gumbel_softmax).  The PyTorch module returns only `x`
    (untouched); the gumbel-softmax tensor is returned as an auxiliary output
    (no kernel pass-through copy of x is made).
    """
    orig_shape = x.shape
    last = int(orig_shape[-1])
    rows = math.prod(orig_shape[:-1]) if len(orig_shape) > 1 else 1
    inv_tau = 1.0 / get_tau(epoch)

    # ---- lane-dense packing: 128 // last softmax groups per 128-lane row ----
    if last < 128 and 128 % last == 0 and (rows * last) % 128 == 0:
        group_w = last
        packed_last = 128
        packed_rows = (rows * last) // 128
    else:
        group_w = last                     # one softmax group per row
        packed_last = last
        packed_rows = rows
    x2d = x.reshape(packed_rows, packed_last)          # contiguous -> free

    # ---- padding-aware tile sizing (f32 compute, lane-padded to 128) --------
    SUBLANE = 8
    padded_last = max(128, ((packed_last + 127) // 128) * 128)
    bytes_per_row = padded_last * 4
    if SUBLANE * bytes_per_row > 8 * 1024 * 1024:
        # TODO(synk): online softmax over a second "arbitrary" column grid axis
        # for very wide last dims; fail loudly instead of silently OOMing VMEM.
        raise NotImplementedError(
            f"last dim {last} is too wide for the single-tile softmax kernel")

    target_block_bytes = 4 * 1024 * 1024               # ~4 MiB tiles
    cand = max(SUBLANE, (target_block_bytes // bytes_per_row) // SUBLANE * SUBLANE)
    if packed_rows > SUBLANE:
        # keep >= 2 grid steps so the "parallel" axis can feed both v7x TCs
        half = -(-packed_rows // 2)
        half = -(-half // SUBLANE) * SUBLANE
        cand = min(cand, half)
    tile_rows = packed_rows if cand >= packed_rows else cand
    num_blocks = pl.cdiv(packed_rows, tile_rows)

    numel = x.size
    kernel = functools.partial(
        _gumbel_softmax_kernel, seed=int(seed), inv_tau=float(inv_tau),
        eps=float(eps), group_w=group_w)

    gs2d = pl.pallas_call(
        kernel,
        out_shape=jax.ShapeDtypeStruct((packed_rows, packed_last), x.dtype),
        grid=(num_blocks,),
        in_specs=[pl.BlockSpec((tile_rows, packed_last), lambda i: (i, 0))],
        out_specs=pl.BlockSpec((tile_rows, packed_last), lambda i: (i, 0)),
        compiler_params=pltpu.CompilerParams(
            dimension_semantics=("parallel",),
            vmem_limit_bytes=48 * 1024 * 1024,
        ),
        cost_estimate=pl.CostEstimate(
            flops=20 * numel,
            transcendentals=3 * numel,
            bytes_accessed=2 * numel * x.dtype.itemsize,
        ),
    )(x2d)

    # The module's forward returns the untouched input (no kernel copy needed).
    return x, gs2d.reshape(orig_shape)


def _reference_gumbel_softmax(x, epoch, seed, eps=1e-20):
    """Pure-JAX reference using the same counter-based noise."""
    tau = get_tau(epoch)
    idx = jnp.arange(x.size, dtype=jnp.int32).reshape(x.shape)
    u = _hash_uniform(idx, seed)
    gumbel = -jnp.log(-jnp.log(u + eps) + eps)
    return jax.nn.softmax((x + gumbel) / tau, axis=-1)


if __name__ == "__main__":
    key = jax.random.PRNGKey(0)
    # NCHW: batch=2, channels=4, spatial 16x16; softmax over the last dim (W=16)
    x = jax.random.normal(key, (2, 4, 16, 16), dtype=jnp.float32)
    epoch = 10

    x_out, gs = gumbel_softmax_forward(x, epoch, seed=0)
    jax.block_until_ready((x_out, gs))

    # Module returns x unchanged.
    assert x_out.shape == x.shape and bool(jnp.all(x_out == x)), \
        "forward must return the original input"
    # gs is a valid per-row softmax and matches the pure-JAX reference.
    assert gs.shape == x.shape
    assert bool(jnp.all(jnp.isfinite(gs)))
    assert jnp.allclose(jnp.sum(gs, axis=-1), 1.0, atol=1e-5)
    ref = _reference_gumbel_softmax(x, epoch, seed=0)
    assert jnp.allclose(gs, ref, rtol=5e-4, atol=1e-5), \
        float(jnp.max(jnp.abs(gs - ref)))

    print("KERNEL_OK")
</pallas_src>

<mosaic_0001>
module attributes {stable_mosaic.version = 11 : i64} {
  func.func @_gumbel_softmax_kernel(%arg0: i32, %arg1: memref<8x128xf32, #tpu.memory_space<vmem>>, %arg2: memref<8x128xf32, #tpu.memory_space<vmem>>) attributes {dimension_semantics = [#tpu.dimension_semantics<parallel>], iteration_bounds = array<i64: 2>, scalar_prefetch = 0 : i64, scratch_operands = 0 : i64, tpu.core_type = #tpu.core_type<tc>, window_params = [{transform_indices = @transform_0, window_bounds = array<i64: 8, 128>}, {transform_indices = @transform_1, window_bounds = array<i64: 8, 128>}]} {
    %c0 = arith.constant 0 : index
    %c0_0 = arith.constant 0 : index
    %0 = vector.load %arg1[%c0, %c0_0] : memref<8x128xf32, #tpu.memory_space<vmem>>, vector<8x128xf32>
    %1 = tpu.iota {dimensions = array<i32: 0>} : vector<8x128xi32>
    %c8_i32 = arith.constant 8 : i32
    %2 = arith.muli %arg0, %c8_i32 : i32
    %3 = vector.broadcast %2 : i32 to vector<8x128xi32>
    %4 = arith.addi %1, %3 : vector<8x128xi32>
    %5 = tpu.iota {dimensions = array<i32: 1>} : vector<8x128xi32>
    %c128_i32 = arith.constant 128 : i32
    %6 = vector.broadcast %c128_i32 : i32 to vector<8x128xi32>
    %7 = arith.muli %4, %6 : vector<8x128xi32>
    %8 = arith.addi %7, %5 : vector<8x128xi32>
    %c-2048144789_i32 = arith.constant -2048144789 : i32
    %9 = vector.broadcast %c-2048144789_i32 : i32 to vector<8x128xi32>
    %10 = arith.xori %8, %9 : vector<8x128xi32>
    %c16_i32 = arith.constant 16 : i32
    %11 = vector.broadcast %c16_i32 : i32 to vector<8x128xi32>
    %12 = arith.shrui %10, %11 : vector<8x128xi32>
    %13 = arith.xori %10, %12 : vector<8x128xi32>
    %c2146121005_i32 = arith.constant 2146121005 : i32
    %14 = vector.broadcast %c2146121005_i32 : i32 to vector<8x128xi32>
    %15 = arith.muli %13, %14 : vector<8x128xi32>
    %c15_i32 = arith.constant 15 : i32
    %16 = vector.broadcast %c15_i32 : i32 to vector<8x128xi32>
    %17 = arith.shrui %15, %16 : vector<8x128xi32>
    %18 = arith.xori %15, %17 : vector<8x128xi32>
    %c-2073254261_i32 = arith.constant -2073254261 : i32
    %19 = vector.broadcast %c-2073254261_i32 : i32 to vector<8x128xi32>
    %20 = arith.muli %18, %19 : vector<8x128xi32>
    %c16_i32_1 = arith.constant 16 : i32
    %21 = vector.broadcast %c16_i32_1 : i32 to vector<8x128xi32>
    %22 = arith.shrui %20, %21 : vector<8x128xi32>
    %23 = arith.xori %20, %22 : vector<8x128xi32>
    %c8_i32_2 = arith.constant 8 : i32
    %24 = vector.broadcast %c8_i32_2 : i32 to vector<8x128xi32>
    %25 = arith.shrui %23, %24 : vector<8x128xi32>
    %26 = arith.sitofp %25 : vector<8x128xi32> to vector<8x128xf32>
    %cst = arith.constant 5.96046448E-8 : f32
    %27 = vector.broadcast %cst : f32 to vector<8x128xf32>
    %28 = arith.mulf %26, %27 : vector<8x128xf32>
    %cst_3 = arith.constant 9.99999968E-21 : f32
    %29 = vector.broadcast %cst_3 : f32 to vector<8x128xf32>
    %30 = arith.addf %28, %29 : vector<8x128xf32>
    %31 = math.log %30 : vector<8x128xf32>
    %cst_4 = arith.constant 0.000000e+00 : f32
    %32 = vector.broadcast %cst_4 : f32 to vector<8x128xf32>
    %33 = arith.subf %32, %31 : vector<8x128xf32>
    %cst_5 = arith.constant 9.99999968E-21 : f32
    %34 = vector.broadcast %cst_5 : f32 to vector<8x128xf32>
    %35 = arith.addf %33, %34 : vector<8x128xf32>
    %36 = math.log %35 : vector<8x128xf32>
    %cst_6 = arith.constant 0.000000e+00 : f32
    %37 = vector.broadcast %cst_6 : f32 to vector<8x128xf32>
    %38 = arith.subf %37, %36 : vector<8x128xf32>
    %39 = arith.addf %0, %38 : vector<8x128xf32>
    %cst_7 = arith.constant 0.204658598 : f32
    %40 = vector.broadcast %cst_7 : f32 to vector<8x128xf32>
    %41 = arith.mulf %39, %40 : vector<8x128xf32>
    %42 = vector.extract_strided_slice %41 {offsets = [0, 0], sizes = [8, 16], strides = [1, 1]} : vector<8x128xf32> to vector<8x16xf32>
    %cst_8 = arith.constant dense<0xFF800000> : vector<8xf32>
    %43 = vector.multi_reduction <maximumf>, %42, %cst_8 [1] : vector<8x16xf32> to vector<8xf32>
    %44 = vector.shape_cast %43 : vector<8xf32> to vector<8x1xf32>
    %45 = vector.shape_cast %44 : vector<8x1xf32> to vector<8x1xf32>
    %46 = vector.broadcast %45 : vector<8x1xf32> to vector<8x16xf32>
    %47 = vector.extract_strided_slice %41 {offsets = [0, 16], sizes = [8, 16], strides = [1, 1]} : vector<8x128xf32> to vector<8x16xf32>
    %cst_9 = arith.constant dense<0xFF800000> : vector<8xf32>
    %48 = vector.multi_reduction <maximumf>, %47, %cst_9 [1] : vector<8x16xf32> to vector<8xf32>
    %49 = vector.shape_cast %48 : vector<8xf32> to vector<8x1xf32>
    %50 = vector.shape_cast %49 : vector<8x1xf32> to vector<8x1xf32>
    %51 = vector.broadcast %50 : vector<8x1xf32> to vector<8x16xf32>
    %52 = vector.extract_strided_slice %41 {offsets = [0, 32], sizes = [8, 16], strides = [1, 1]} : vector<8x128xf32> to vector<8x16xf32>
    %cst_10 = arith.constant dense<0xFF800000> : vector<8xf32>
    %53 = vector.multi_reduction <maximumf>, %52, %cst_10 [1] : vector<8x16xf32> to vector<8xf32>
    %54 = vector.shape_cast %53 : vector<8xf32> to vector<8x1xf32>
    %55 = vector.shape_cast %54 : vector<8x1xf32> to vector<8x1xf32>
    %56 = vector.broadcast %55 : vector<8x1xf32> to vector<8x16xf32>
    %57 = vector.extract_strided_slice %41 {offsets = [0, 48], sizes = [8, 16], strides = [1, 1]} : vector<8x128xf32> to vector<8x16xf32>
    %cst_11 = arith.constant dense<0xFF800000> : vector<8xf32>
    %58 = vector.multi_reduction <maximumf>, %57, %cst_11 [1] : vector<8x16xf32> to vector<8xf32>
    %59 = vector.shape_cast %58 : vector<8xf32> to vector<8x1xf32>
    %60 = vector.shape_cast %59 : vector<8x1xf32> to vector<8x1xf32>
    %61 = vector.broadcast %60 : vector<8x1xf32> to vector<8x16xf32>
    %62 = vector.extract_strided_slice %41 {offsets = [0, 64], sizes = [8, 16], strides = [1, 1]} : vector<8x128xf32> to vector<8x16xf32>
    %cst_12 = arith.constant dense<0xFF800000> : vector<8xf32>
    %63 = vector.multi_reduction <maximumf>, %62, %cst_12 [1] : vector<8x16xf32> to vector<8xf32>
    %64 = vector.shape_cast %63 : vector<8xf32> to vector<8x1xf32>
    %65 = vector.shape_cast %64 : vector<8x1xf32> to vector<8x1xf32>
    %66 = vector.broadcast %65 : vector<8x1xf32> to vector<8x16xf32>
    %67 = vector.extract_strided_slice %41 {offsets = [0, 80], sizes = [8, 16], strides = [1, 1]} : vector<8x128xf32> to vector<8x16xf32>
    %cst_13 = arith.constant dense<0xFF800000> : vector<8xf32>
    %68 = vector.multi_reduction <maximumf>, %67, %cst_13 [1] : vector<8x16xf32> to vector<8xf32>
    %69 = vector.shape_cast %68 : vector<8xf32> to vector<8x1xf32>
    %70 = vector.shape_cast %69 : vector<8x1xf32> to vector<8x1xf32>
    %71 = vector.broadcast %70 : vector<8x1xf32> to vector<8x16xf32>
    %72 = vector.extract_strided_slice %41 {offsets = [0, 96], sizes = [8, 16], strides = [1, 1]} : vector<8x128xf32> to vector<8x16xf32>
    %cst_14 = arith.constant dense<0xFF800000> : vector<8xf32>
    %73 = vector.multi_reduction <maximumf>, %72, %cst_14 [1] : vector<8x16xf32> to vector<8xf32>
    %74 = vector.shape_cast %73 : vector<8xf32> to vector<8x1xf32>
    %75 = vector.shape_cast %74 : vector<8x1xf32> to vector<8x1xf32>
    %76 = vector.broadcast %75 : vector<8x1xf32> to vector<8x16xf32>
    %77 = vector.extract_strided_slice %41 {offsets = [0, 112], sizes = [8, 16], strides = [1, 1]} : vector<8x128xf32> to vector<8x16xf32>
    %cst_15 = arith.constant dense<0xFF800000> : vector<8xf32>
    %78 = vector.multi_reduction <maximumf>, %77, %cst_15 [1] : vector<8x16xf32> to vector<8xf32>
    %79 = vector.shape_cast %78 : vector<8xf32> to vector<8x1xf32>
    %80 = vector.shape_cast %79 : vector<8x1xf32> to vector<8x1xf32>
    %81 = vector.broadcast %80 : vector<8x1xf32> to vector<8x16xf32>
    %82 = tpu.concatenate %46, %51, %56, %61, %66, %71, %76, %81 in 1 : vector<8x16xf32>, vector<8x16xf32>, vector<8x16xf32>, vector<8x16xf32>, vector<8x16xf32>, vector<8x16xf32>, vector<8x16xf32>, vector<8x16xf32> -> vector<8x128xf32>
    %83 = arith.subf %41, %82 : vector<8x128xf32>
    %84 = math.exp %83 : vector<8x128xf32>
    %85 = vector.extract_strided_slice %84 {offsets = [0, 0], sizes = [8, 16], strides = [1, 1]} : vector<8x128xf32> to vector<8x16xf32>
    %cst_16 = arith.constant dense<0.000000e+00> : vector<8xf32>
    %86 = vector.multi_reduction <add>, %85, %cst_16 [1] : vector<8x16xf32> to vector<8xf32>
    %87 = vector.shape_cast %86 : vector<8xf32> to vector<8x1xf32>
    %88 = vector.shape_cast %87 : vector<8x1xf32> to vector<8x1xf32>
    %89 = vector.broadcast %88 : vector<8x1xf32> to vector<8x16xf32>
    %90 = vector.extract_strided_slice %84 {offsets = [0, 16], sizes = [8, 16], strides = [1, 1]} : vector<8x128xf32> to vector<8x16xf32>
    %cst_17 = arith.constant dense<0.000000e+00> : vector<8xf32>
    %91 = vector.multi_reduction <add>, %90, %cst_17 [1] : vector<8x16xf32> to vector<8xf32>
    %92 = vector.shape_cast %91 : vector<8xf32> to vector<8x1xf32>
    %93 = vector.shape_cast %92 : vector<8x1xf32> to vector<8x1xf32>
    %94 = vector.broadcast %93 : vector<8x1xf32> to vector<8x16xf32>
    %95 = vector.extract_strided_slice %84 {offsets = [0, 32], sizes = [8, 16], strides = [1, 1]} : vector<8x128xf32> to vector<8x16xf32>
    %cst_18 = arith.constant dense<0.000000e+00> : vector<8xf32>
    %96 = vector.multi_reduction <add>, %95, %cst_18 [1] : vector<8x16xf32> to vector<8xf32>
    %97 = vector.shape_cast %96 : vector<8xf32> to vector<8x1xf32>
    %98 = vector.shape_cast %97 : vector<8x1xf32> to vector<8x1xf32>
    %99 = vector.broadcast %98 : vector<8x1xf32> to vector<8x16xf32>
    %100 = vector.extract_strided_slice %84 {offsets = [0, 48], sizes = [8, 16], strides = [1, 1]} : vector<8x128xf32> to vector<8x16xf32>
    %cst_19 = arith.constant dense<0.000000e+00> : vector<8xf32>
    %101 = vector.multi_reduction <add>, %100, %cst_19 [1] : vector<8x16xf32> to vector<8xf32>
    %102 = vector.shape_cast %101 : vector<8xf32> to vector<8x1xf32>
    %103 = vector.shape_cast %102 : vector<8x1xf32> to vector<8x1xf32>
    %104 = vector.broadcast %103 : vector<8x1xf32> to vector<8x16xf32>
    %105 = vector.extract_strided_slice %84 {offsets = [0, 64], sizes = [8, 16], strides = [1, 1]} : vector<8x128xf32> to vector<8x16xf32>
    %cst_20 = arith.constant dense<0.000000e+00> : vector<8xf32>
    %106 = vector.multi_reduction <add>, %105, %cst_20 [1] : vector<8x16xf32> to vector<8xf32>
    %107 = vector.shape_cast %106 : vector<8xf32> to vector<8x1xf32>
    %108 = vector.shape_cast %107 : vector<8x1xf32> to vector<8x1xf32>
    %109 = vector.broadcast %108 : vector<8x1xf32> to vector<8x16xf32>
    %110 = vector.extract_strided_slice %84 {offsets = [0, 80], sizes = [8, 16], strides = [1, 1]} : vector<8x128xf32> to vector<8x16xf32>
    %cst_21 = arith.constant dense<0.000000e+00> : vector<8xf32>
    %111 = vector.multi_reduction <add>, %110, %cst_21 [1] : vector<8x16xf32> to vector<8xf32>
    %112 = vector.shape_cast %111 : vector<8xf32> to vector<8x1xf32>
    %113 = vector.shape_cast %112 : vector<8x1xf32> to vector<8x1xf32>
    %114 = vector.broadcast %113 : vector<8x1xf32> to vector<8x16xf32>
    %115 = vector.extract_strided_slice %84 {offsets = [0, 96], sizes = [8, 16], strides = [1, 1]} : vector<8x128xf32> to vector<8x16xf32>
    %cst_22 = arith.constant dense<0.000000e+00> : vector<8xf32>
    %116 = vector.multi_reduction <add>, %115, %cst_22 [1] : vector<8x16xf32> to vector<8xf32>
    %117 = vector.shape_cast %116 : vector<8xf32> to vector<8x1xf32>
    %118 = vector.shape_cast %117 : vector<8x1xf32> to vector<8x1xf32>
    %119 = vector.broadcast %118 : vector<8x1xf32> to vector<8x16xf32>
    %120 = vector.extract_strided_slice %84 {offsets = [0, 112], sizes = [8, 16], strides = [1, 1]} : vector<8x128xf32> to vector<8x16xf32>
    %cst_23 = arith.constant dense<0.000000e+00> : vector<8xf32>
    %121 = vector.multi_reduction <add>, %120, %cst_23 [1] : vector<8x16xf32> to vector<8xf32>
    %122 = vector.shape_cast %121 : vector<8xf32> to vector<8x1xf32>
    %123 = vector.shape_cast %122 : vector<8x1xf32> to vector<8x1xf32>
    %124 = vector.broadcast %123 : vector<8x1xf32> to vector<8x16xf32>
    %125 = tpu.concatenate %89, %94, %99, %104, %109, %114, %119, %124 in 1 : vector<8x16xf32>, vector<8x16xf32>, vector<8x16xf32>, vector<8x16xf32>, vector<8x16xf32>, vector<8x16xf32>, vector<8x16xf32>, vector<8x16xf32> -> vector<8x128xf32>
    %126 = arith.divf %84, %125 : vector<8x128xf32>
    %c0_24 = arith.constant 0 : index
    %c0_25 = arith.constant 0 : index
    %127 = vector.load %arg2[%c0_24, %c0_25] : memref<8x128xf32, #tpu.memory_space<vmem>>, vector<8x128xf32>
    tpu.vector_store %arg2[%c0_24, %c0_25], %126 {strides = array<i32>} : memref<8x128xf32, #tpu.memory_space<vmem>>, vector<8x128xf32>,
    return
  }
  func.func @transform_0(%arg0: i32) -> (i32, i32) {
    %c0_i32 = arith.constant 0 : i32
    %c0_i32_0 = arith.constant 0 : i32
    return %arg0, %c0_i32 : i32, i32
  }
  func.func @transform_1(%arg0: i32) -> (i32, i32) {
    %c0_i32 = arith.constant 0 : i32
    %c0_i32_0 = arith.constant 0 : i32
    return %arg0, %c0_i32 : i32, i32
  }
}

</mosaic_0001>

<bundles_post_ra>
// kernel: tpu_custom_call.1
= control target key start
LH: loop header
LB: loop body
LE: loop exit
PB: predicated region body
PF: predicated region fallthrough
CT: control target
= control target key end

     0   :  { %6 = vsyncpa [#allocation3], 0  ;;  %s735_s0 = inlined_call_operand.hbm [shape: f32[16,128], index: 0, kind: input, shape index: {}]   ;;  %s736_s1 = inlined_call_operand.hbm [shape: f32[16,128], index: 1, kind: output, shape index: {}]  }
   0x1   :  { %8 = vsyncpa [#allocation3 + $0x1], 0 }
   0x2   :  { %9 = vsyncpa [#allocation4], 0 }
   0x3   :  { %11 = vsyncpa [#allocation4 + $0x1], 0  ;;  %s543_s6 = smov 0   ;;  %s545_s7 = smov 0  }
   0x4   :  { %s547_s8 = smov 0   ;;  %s549_s9 = smov 0  }
   0x5 LB: > { %s564_s10 = sadd.s32 4294967295, %s522_s9   ;;  %s352_s11 = sadd.s32 4294967294, %s522_s9   ;;  %s522_s9 = sphi %s549_s9, %s751_s9   ;;  %s518_s8 = sphi %s547_s8, %s750_s8   ;;  %s514_s7 = sphi %s545_s7, %s749_s7   ;;  %s510_s6 = sphi %s543_s6, %s748_s6  }
   0x6   : > { %s568_s12 = sadd.s32 1, %s522_s9   ;;  %s24_s13 = sadd.s32 1, %s518_s8 }
   0x7   : > { %s21_s14 = ssub.s32 %s522_s9, %s568_s12  ;;  %p31_p0 = scmp.ne.s32.totalorder %s518_s8, %s514_s7 }
   0x8   : > { %p22_p1 = scmp.eq.s32.totalorder %s21_s14, 0  ;;  %p32_p2 = scmp.eq.s32.totalorder %s522_s9, 0 }
   0x9   : > { %p37_p3 = scmp.ne.s32.totalorder %s514_s7, %s510_s6  ;;  %p38_p4 = scmp.eq.s32.totalorder %s564_s10, 0 }
   0xa   : > { %s580_s15 = scalar_select %p22_p1, %s518_s8, %s24_s13  }
   0xb   : > { %p582_p5 = por %p32_p2, %p31_p0  ;;  %p586_p6 = por %p38_p4, %p37_p3 }
   0xc   : > { %p61_p7 = scmp.eq.s32.totalorder %s564_s10, 1  ;;  %p67_p8 = scmp.eq.s32.totalorder %s352_s11, 1 }
   0xd   : > { %p377_p10 = scmp.lt.s32.totalorder %s522_s9, 2  ;;  %s87_s20 = sand.u32 1, %s518_s8  }
   0xe   : > { %p593_p11 = por %p61_p7, %p31_p0  ;;  %p597_p12 = por %p67_p8, %p37_p3 }
   0xf   : > { %s356_s21 = sshll.u32 %s522_s9, 7  ;;  %s355_s22 = sshll.u32 %s87_s20, 3 }
  0x10   : > { %s740_s18 = scalar_select %p593_p11, 1, 0 }
  0x11   : > { %s741_s19 = scalar_select %p597_p12, 1, 0 }
  0x12   : > { %s606_s25 = scalar_lea.hbm %s735_s0, %s356_s21  ;;  %s91_s26 = scalar_lea.vmem [#allocation2], %s355_s22 }
  0x13   : > { %s98_s27 = sshll.u32 %s91_s26, 4  ;;  %p610_p13 = pnand %p377_p10, %p582_p5  ;;  %s614_s27 = int_to_ptr.vmem [resolvable:$true] %s98_s27 }
  0x14   : > { %s88_s29 = scalar_lea.sflag [#allocation3], %s87_s20  ;;  %s426_s30 = scalar_lea.hbm %s606_s25, 128 }
  0x15   : > { %p427_p2 = scmp.ne.s32.totalorder %s606_s25, %s426_s30  ;;  %p428_p3 = pneg %p610_p13 }
  0x16   : > { %s431_s4 = scalar_lea.hbm %s735_s0, 256  ;;  %p432_p5 = scmp.lt.u32.totalorder %s606_s25, %s735_s0 }
  0x17   : > { %p429_p4 = pnand %p428_p3, %p427_p2  ;;  %p433_p8 = scmp.lt.u32.totalorder %s431_s4, %s426_s30 }
  0x18   : > { %p435_p9 = scmp.lt.u32.totalorder %s426_s30, %s606_s25 }
  0x19   : > { %p430_p7 = pneg %p429_p4  ;;  %p434_p10 = por %p433_p8, %p432_p5 }
  0x1b   : > { %p436_p0 = por %p435_p9, %p434_p10 }
  0x1d   : > { %p437_p1 = pnand %p436_p0, %p430_p7 }
  0x1f   : > { %440 = shalt.err (!%p437_p1)
}
  0x20   : > { %s441_s13 = scalar_lea.vmem %s614_s27, 128  ;;  %s524_s14 = smov [#allocation2]  }
  0x21   : > { %p442_p2 = scmp.ne.s32.totalorder %s614_s27, %s441_s13  ;;  %s446_s16 = sshll.u32 %s524_s14, 4  ;;  %s447_s16 = int_to_ptr.vmem [resolvable:$false] %s446_s16 }
  0x22   : > { %s448_s20 = scalar_lea.vmem %s447_s16, 256  ;;  %p449_p11 = scmp.lt.s32.totalorder %s614_s27, %s447_s16 }
  0x23   : > { %p444_p4 = pnand %p442_p2, %p428_p3  ;;  %p450_p5 = scmp.lt.s32.totalorder %s448_s20, %s441_s13 }
  0x25   : > { %p445_p12 = pneg %p444_p4  ;;  %p451_p8 = por %p450_p5, %p449_p11 }
  0x27   : > { %p452_p9 = pnand %p451_p8, %p445_p12 }
  0x29   : > { %455 = shalt.err (!%p452_p9)
}
  0x2a   : > { %372 = dma.hbm_to_vmem [thread:$0]  (!%p610_p13), %s606_s25, 128, %s614_s27, %s88_s29  }
  0x2b   : > { %p743_p0 = scmp.lt.s32.totalorder %s522_s9, 3  ;;  %p744_p1 = scmp.ge.s32.totalorder %s522_s9, 1 }
  0x2d   : > { %p104_p3 = pnand %p744_p1, %p743_p0 }
  0x2e   : > { %s648_s21 = sand.u32 (!%p104_p3), 1, %s514_s7  }
  0x2f   : > { %107 = sbr.rel (%p104_p3) target bundleno = 605 (0x25d), region = 24  ;;  %s358_s22 = sshll.u32 (!%p104_p3), %s648_s21, 3 }
  0x30   : > { %s110_s23 = scalar_lea.sflag (!%p104_p3), [#allocation3], %s648_s21  ;;  %s654_s24 = scalar_lea.vmem (!%p104_p3), [#allocation2], %s358_s22 }
  0x36   : > { %501 = dma.done.wait (%p586_p6), %s110_s23, 128  }
  0x37   : > { %503 = vsyncadd (%p586_p6), %s110_s23, 4294967168  ;;  %v133_v0 = vlaneseq  ;;  %s360_s25 = sshll.u32 %s564_s10, 3  ;;  %v132_v26 = vld [vmem:[%s654_s24] sm:$0xff]  ;;  %vm164_vm0 = vcmask 130048   ;;  %vm172_vm1 = vcmask 392448   ;;  %vm168_vm2 = vcmask 261248  }
  0x38   : > { %v136_v1 = vstv %s360_s25  ;;  %vm176_vm3 = vcmask 523648   ;;  %vm180_vm4 = vcmask 654848   ;;  %vm184_vm5 = vcmask 786048   ;;  %s525_s17 = smov 96   ;;  %s526_s26 = smov 112  }
  0x39   : > { %v134_v2 = vshrl.u32 %v133_v0, 7  ;;  %v139_v4 = vand.u32 127, %v133_v0  ;;  %vm188_vm6 = vcmask 917248   ;;  %vm192_vm7 = vcmask 1048448   ;;  %s527_s27 = smov 80   ;;  %s528_s28 = smov 64  }
  0x3a   : > { %vm197_vm8 = vcmask 261120   ;;  %vm199_vm9 = vcmask 392192   ;;  %vm201_vm10 = vcmask 523264   ;;  %vm203_vm11 = vcmask 654336   ;;  %s529_s29 = smov 48   ;;  %s530_s30 = smov 32  }
  0x3b   : > { %v137_v3 = vadd.s32 %v136_v1, %v134_v2  ;;  %vm205_vm12 = vcmask 785408   ;;  %vm207_vm13 = vcmask 916480   ;;  %s531_s2 = smov 16   ;;  %s362_s3 = sshll.u32 %s564_s10, 7 }
  0x3c   : > { %s131_s4 = scalar_lea.vmem [#allocation5], %s358_s22  ;;  %s691_s14 = scalar_lea.hbm %s736_s1, %s362_s3 }
  0x3d   : > { %v140_v5 = vmul.u32 128, %v137_v3  ;;  %s282_s5 = sshll.u32 %s131_s4, 4  ;;  %s269_s16 = scalar_lea.sflag [#allocation4], %s648_s21  ;;  %s693_s5 = int_to_ptr.vmem [resolvable:$true] %s282_s5 }
  0x3e   : > { %s456_s20 = scalar_lea.vmem %s693_s5, 128  ;;  %p745_p11 = scmp.ne.s32.totalorder %s740_s18, 0 }
  0x3f   : > { %v141_v6 = vadd.s32 %v140_v5, %v139_v4  ;;  %p457_p6 = scmp.ne.s32.totalorder %s693_s5, %s456_s20  ;;  %s532_s10 = smov [#allocation5]  }
  0x40   : > { %s460_s22 = sshll.u32 %s532_s10, 4  ;;  %s461_s22 = int_to_ptr.vmem [resolvable:$false] %s460_s22 }
  0x41   : > { %v142_v7 = vxor.u32 2246822507, %v141_v6  ;;  %p458_p12 = pnand %p457_p6, %p745_p11  ;;  %s462_s23 = scalar_lea.vmem %s461_s22, 256 }
  0x42   : > { %p463_p7 = scmp.lt.s32.totalorder %s693_s5, %s461_s22  ;;  %p464_p10 = scmp.lt.s32.totalorder %s462_s23, %s456_s20 }
  0x43   : > { %v143_v8 = vshrl.u32 %v142_v7, 16  ;;  %p459_p13 = pneg %p458_p12 }
  0x44   : > { %p465_p2 = por %p464_p10, %p463_p7 }
  0x45   : > { %v144_v9 = vxor.u32 %v143_v8, %v142_v7 }
  0x46   : > { %p466_p4 = pnand %p465_p2, %p459_p13 }
  0x47   : > { %v145_v10 = vmul.u32 2146121005, %v144_v9 }
  0x49   : > { %v146_v11 = vshrl.u32 %v145_v10, 15 }
  0x4b   : > { %v147_v12 = vxor.u32 %v146_v11, %v145_v10 }
  0x4d   : > { %v148_v13 = vmul.u32 2221713035, %v147_v12 }
  0x4f   : > { %v149_v14 = vshrl.u32 %v148_v13, 16 }
  0x51   : > { %v150_v15 = vxor.u32 %v149_v14, %v148_v13 }
  0x53   : > { %v151_v16 = vshrl.u32 %v150_v15, 8 }
  0x55   : > { %v152_v17 = vcvt.s32.f32 %v151_v16 }
  0x57   : > { %v153_v18 = vmul.f32 5.9604645e-08, %v152_v17 }
  0x59   : > { %v154_v19 = vadd.f32 1e-20, %v153_v18 }
  0x5b   : > { %418 = vlog2.f32 %v154_v19 }
  0x65   : > { %v419_v20 = vpop.eup %418 }
  0x66   : > { %v156_v21 = vmul.f32 0.6931472, %v419_v20 }
  0x68   : > { %v157_v22 = vsub.f32 0.0, %v156_v21 }
  0x6a   : > { %v158_v23 = vadd.f32 1e-20, %v157_v22 }
  0x6c   : > { %420 = vlog2.f32 %v158_v23 }
  0x76   : > { %v421_v24 = vpop.eup %420 }
  0x77   : > { %v160_v25 = vmul.f32 0.6931472, %v421_v24 }
  0x79   : > { %v161_v27 = vsub.f32 0.0, %v160_v25 }
  0x7b   : > { %v162_v28 = vadd.f32 %v161_v27, %v132_v26 }
  0x7d   : > { %v163_v29 = vmul.f32 0.2046586, %v162_v28 }
  0x7f   : > { %v165_v30 = vsel %vm164_vm0, %v163_v29, -inf  ;;  %v173_v31 = vsel %vm172_vm1, %v163_v29, -inf  ;;  %v169_v32 = vsel %vm168_vm2, %v163_v29, -inf  ;;  %v177_v33 = vsel %vm176_vm3, %v163_v29, -inf }
  0x80   : > { %166 = vmax.xlane.f32.xlu0 %v165_v30  ;;  %174 = vmax.xlane.f32.xlu1 %v173_v31  ;;  %v181_v34 = vsel %vm180_vm4, %v163_v29, -inf  ;;  %v185_v35 = vsel %vm184_vm5, %v163_v29, -inf  ;;  %v189_v36 = vsel %vm188_vm6, %v163_v29, -inf  ;;  %v193_v37 = vsel %vm192_vm7, %v163_v29, -inf }
  0x84   : > { %170 = vmax.xlane.f32.xlu0 %v169_v32  ;;  %178 = vmax.xlane.f32.xlu1 %v177_v33 }
  0x88   : > { %182 = vmax.xlane.f32.xlu0 %v181_v34  ;;  %186 = vmax.xlane.f32.xlu1 %v185_v35 }
  0x8c   : > { %190 = vmax.xlane.f32.xlu0 %v189_v36  ;;  %194 = vmax.xlane.f32.xlu1 %v193_v37 }
 0x10d   : > { %v167_v38 = vpop.xlane.xlu0 %166  ;;  %v175_v39 = vpop.xlane.xlu1 %174 }
 0x111   : > { %v171_v40 = vpop.xlane.xlu0 %170  ;;  %v179_v41 = vpop.xlane.xlu1 %178 }
 0x112   : > { %v196_v42 = vsel %vm164_vm0, %v167_v38, %v171_v40 }
 0x113   : > { %v198_v43 = vsel %vm197_vm8, %v196_v42, %v175_v39 }
 0x114   : > { %v200_v44 = vsel %vm199_vm9, %v198_v43, %v179_v41 }
 0x115   : > { %v183_v45 = vpop.xlane.xlu0 %182  ;;  %v187_v46 = vpop.xlane.xlu1 %186 }
 0x116   : > { %v202_v47 = vsel %vm201_vm10, %v200_v44, %v183_v45 }
 0x117   : > { %v204_v48 = vsel %vm203_vm11, %v202_v47, %v187_v46 }
 0x119   : > { %v191_v49 = vpop.xlane.xlu0 %190  ;;  %v195_v50 = vpop.xlane.xlu1 %194 }
 0x11a   : > { %v206_v51 = vsel %vm205_vm12, %v204_v48, %v191_v49 }
 0x11b   : > { %v208_v52 = vsel %vm207_vm13, %v206_v51, %v195_v50 }
 0x11c   : > { %v209_v53 = vsub.f32 %v163_v29, %v208_v52 }
 0x11e   : > { %v210_v54 = vmul.f32 1.442695, %v209_v53 }
 0x120   : > { %422 = vpow2.f32 %v210_v54 }
 0x12a   : > { %v423_v55 = vpop.eup %422 }
 0x12b   : > { %222 = vrot.lane.b32.xlu0 %v423_v55, %s525_s17  ;;  %216 = vrot.lane.b32.xlu1 %v423_v55, %s526_s26  ;;  %v212_v56 = vsel %vm164_vm0, %v423_v55, 0.0 }
 0x12f   : > { %228 = vrot.lane.b32.xlu0 %v423_v55, %s527_s27 }
 0x133   : > { %234 = vrot.lane.b32.xlu0 %v423_v55, %s528_s28 }
 0x137   : > { %240 = vrot.lane.b32.xlu0 %v423_v55, %s529_s29 }
 0x13b   : > { %246 = vrot.lane.b32.xlu0 %v423_v55, %s530_s30 }
 0x13f   : > { %252 = vrot.lane.b32.xlu0 %v423_v55, %s531_s2 }
 0x15e   : > { %213 = vadd.xlane.f32.xlu0 %v212_v56 }
 0x19d   : > { %v223_v57 = vpop.permute.xlu0 %222  ;;  %v217_v58 = vpop.permute.xlu1 %216 }
 0x19e   : > { %v225_v59 = vsel %vm164_vm0, %v223_v57, 0.0  ;;  %v219_v60 = vsel %vm164_vm0, %v217_v58, 0.0 }
 0x19f   : > { %226 = vadd.xlane.f32.xlu1 %v225_v59  ;;  %220 = vadd.xlane.f32.xlu0 %v219_v60 }
 0x1a1   : > { %v229_v61 = vpop.permute.xlu0 %228 }
 0x1a2   : > { %v231_v62 = vsel %vm164_vm0, %v229_v61, 0.0 }
 0x1a3   : > { %232 = vadd.xlane.f32.xlu0 %v231_v62 }
 0x1a5   : > { %v235_v63 = vpop.permute.xlu0 %234 }
 0x1a6   : > { %v237_v0 = vsel %vm164_vm0, %v235_v63, 0.0 }
 0x1a7   : > { %238 = vadd.xlane.f32.xlu1 %v237_v0 }
 0x1a9   : > { %v241_v1 = vpop.permute.xlu0 %240 }
 0x1aa   : > { %v243_v2 = vsel %vm164_vm0, %v241_v1, 0.0 }
 0x1ab   : > { %244 = vadd.xlane.f32.xlu1 %v243_v2 }
 0x1ad   : > { %v247_v3 = vpop.permute.xlu0 %246 }
 0x1ae   : > { %v249_v4 = vsel %vm164_vm0, %v247_v3, 0.0 }
 0x1af   : > { %250 = vadd.xlane.f32.xlu1 %v249_v4 }
 0x1b1   : > { %v253_v5 = vpop.permute.xlu0 %252 }
 0x1b2   : > { %v255_v6 = vsel %vm164_vm0, %v253_v5, 0.0 }
 0x1b3   : > { %256 = vadd.xlane.f32.xlu1 %v255_v6 }
 0x1eb   : > { %v214_v7 = vpop.xlane.xlu0 %213 }
 0x22c   : > { %v227_v8 = vpop.xlane.xlu1 %226  ;;  %v221_v9 = vpop.xlane.xlu0 %220 }
 0x22d   : > { %v258_v12 = vsel %vm164_vm0, %v214_v7, %v221_v9 }
 0x22e   : > { %v259_v14 = vsel %vm197_vm8, %v258_v12, %v227_v8 }
 0x230   : > { %v233_v13 = vpop.xlane.xlu0 %232 }
 0x231   : > { %v260_v16 = vsel %vm199_vm9, %v259_v14, %v233_v13 }
 0x234   : > { %v239_v10 = vpop.xlane.xlu1 %238 }
 0x235   : > { %v261_v17 = vsel %vm201_vm10, %v260_v16, %v239_v10 }
 0x238   : > { %v245_v11 = vpop.xlane.xlu1 %244 }
 0x239   : > { %v262_v18 = vsel %vm203_vm11, %v261_v17, %v245_v11 }
 0x23c   : > { %v251_v15 = vpop.xlane.xlu1 %250 }
 0x23d   : > { %v263_v19 = vsel %vm205_vm12, %v262_v18, %v251_v15 }
 0x240   : > { %v257_v20 = vpop.xlane.xlu1 %256 }
 0x241   : > { %v264_v21 = vsel %vm207_vm13, %v263_v19, %v257_v20 }
 0x242   : > { %424 = vrcp.f32 %v264_v21 }
 0x24c   : > { %v425_v22 = vpop.eup %424 }
 0x24d   : > { %v266_v23 = vmul.f32 %v425_v22, %v423_v55 }
 0x24f   : > { %267 = vst [vmem:[%s131_s4] sm:$0xff] %v266_v23 }
 0x250   : > { %469 = shalt.err (!%p466_p4)
}
 0x251   : > { %s470_s21 = scalar_lea.hbm %s691_s14, 128  ;;  %s474_s17 = scalar_lea.hbm %s736_s1, 256 }
 0x252   : > { %p471_p5 = scmp.ne.s32.totalorder %s691_s14, %s470_s21  ;;  %p475_p0 = scmp.lt.u32.totalorder %s691_s14, %s736_s1 }
 0x253   : > { %p476_p1 = scmp.lt.u32.totalorder %s474_s17, %s470_s21  ;;  %p478_p6 = scmp.lt.u32.totalorder %s470_s21, %s691_s14 }
 0x254   : > { %p472_p8 = pnand %p471_p5, %p745_p11 }
 0x255   : > { %p477_p3 = por %p476_p1, %p475_p0 }
 0x256   : > { %p473_p9 = pneg %p472_p8 }
 0x257   : > { %p479_p12 = por %p478_p6, %p477_p3 }
 0x259   : > { %p480_p13 = pnand %p479_p12, %p473_p9 }
 0x25b   : > { %483 = shalt.err (!%p480_p13)
}
 0x25c   : > { %367 = dma.vmem_to_hbm [thread:$0]  (%p745_p11), %s693_s5, 128, %s691_s14, %s269_s16  }
 0x25d PF: > { %s294_s28 = sand.u32 1, %s510_s6   ;;  %p746_p7 = scmp.ne.s32.totalorder %s741_s19, 0 }
 0x25e   : > { %p747_p10 = scmp.ge.s32.totalorder %s522_s9, 2  ;;  %s295_s29 = scalar_lea.sflag [#allocation4], %s294_s28 }
 0x260   : > { %p374_p2 = pnand %p747_p10, %p746_p7 }
 0x262   : > { %505 = dma.done.wait (!%p374_p2), %s295_s29, 128  }
 0x263   : > { %507 = vsyncadd (!%p374_p2), %s295_s29, 4294967168  ;;  %p14_p4 = scmp.ge.s32.totalorder %s568_s12, 4   ;;  %s748_s6 = smov %s514_s7 }
 0x264   : > { %s749_s7 = smov %s518_s8  ;;  %s750_s8 = smov %s580_s15 }
 0x265   : > { %s751_s9 = smov %s568_s12  ;;  %16 = sbr.rel (!%p14_p4) target bundleno = 5 (0x5), region = 69 }
 0x26c   :  { %300 = vsyncpa [#allocation3], 1 }
 0x26d   :  { %302 = vsyncpa [#allocation3 + $0x1], 1 }
 0x26e   :  { %303 = vsyncpa [#allocation4], 1 }
 0x26f   :  { %305 = vsyncpa [#allocation4 + $0x1], 1 }

</bundles_post_ra>
